<compile_context>
chip_gen: v7x
topology: tpu7x:2x2x1
jax: 0.10.0
libtpu: 0.0.40
codegen_flags: <defaults>
</compile_context>

<pallas_src>
import functools

import jax
import jax.numpy as jnp
from jax.experimental import pallas as pl
from jax.experimental.pallas import tpu as pltpu

# MXU operand dtype: bf16 inputs, f32 accumulation.
_MATMUL_DTYPE = jnp.bfloat16
# Kernel writeback dtype: bf16 halves the dominant (padded) output HBM stream.
_OUT_STORE_DTYPE = jnp.bfloat16


def _round_up(x, m):
    return ((x + m - 1) // m) * m


def _actor_kernel(x_ref, w1_ref, b1_ref, w2_ref, b2_ref, out_ref):
    # Layer 1: Linear(state_dim -> 256) + ReLU.
    # bf16 operands on the MXU, f32 accumulate; bias-add + ReLU in f32 on the
    # VPU (v5e has no bf16 VPU). The bf16 cast of x is kept in-kernel on
    # purpose (a wrapper-side cast would be a separate, un-hidden XLA pass).
    x = x_ref[...].astype(w1_ref.dtype)
    h = jnp.dot(x, w1_ref[...], preferred_element_type=jnp.float32)
    h = jnp.maximum(h + b1_ref[...], 0.0)            # (TB, H) + (1, H)

    # Layer 2: Linear(256 -> action_dim padded to 128) + ReLU.
    # Lane-dense output -> unmasked, fully pipelined vst stores.
    o = jnp.dot(h.astype(w2_ref.dtype), w2_ref[...],
                preferred_element_type=jnp.float32)
    o = jnp.maximum(o + b2_ref[...], 0.0)            # (TB, A_pad) + (1, A_pad)

    # bf16 writeback: halves output-side HBM traffic for free (VPU has slack).
    out_ref[...] = o.astype(out_ref.dtype)
    # TODO(synk): if the consumer immediately softmaxes over the 16 actions,
    # fuse it here (exp -> EUP slot, row-reduce -> XLU slot, both idle); the
    # module contract returns pre-softmax activations, so we don't.


def _pick_batch_tile(B, block_b):
    """Sublane-aligned batch tile; keep >=2 grid steps when possible so the
    'parallel' batch axis shards across both v7x TensorCores."""
    if B <= 8:
        return B                      # single full-extent block
    tb = min(block_b, (B // 8) * 8)   # 8-aligned, never exceeds B
    if pl.cdiv(B, tb) < 2 and B >= 16:
        tb = _round_up(pl.cdiv(B, 2), 8)   # split into ~2 tiles (v7x megacore)
    return tb


@functools.partial(jax.jit, static_argnames=("block_b",))
def dnn_actor_forward(state, w1, b1, w2, b2, *, block_b=4096):
    """state: [B, state_dim]; w1: [state_dim, 256]; b1: [256];
       w2: [256, action_dim]; b2: [action_dim]. Returns [B, action_dim] f32."""
    B, S = state.shape
    H = w1.shape[1]
    A = w2.shape[1]

    # Lane-dense output: pad action_dim up to a multiple of 128 (weights/bias
    # only — tiny, one-time).
    A_pad = _round_up(max(A, 128), 128)
    if A_pad != A:
        w2 = jnp.pad(w2, ((0, 0), (0, A_pad - A)))
        b2 = jnp.pad(b2, ((0, A_pad - A),))

    # Operand dtypes: bf16 for the MXU, f32 biases for the VPU epilogue.
    w1_c = w1.astype(_MATMUL_DTYPE)
    w2_c = w2.astype(_MATMUL_DTYPE)
    b1_2d = b1.reshape(1, H).astype(jnp.float32)
    b2_2d = b2.reshape(1, A_pad).astype(jnp.float32)

    # Batch tiling WITHOUT padding `state` in the wrapper: pl.cdiv grid + Pallas
    # masked tail tile (rows never mix in a row-wise matmul, stores are masked).
    tb = _pick_batch_tile(B, block_b)
    grid = (pl.cdiv(B, tb),)

    cost = pl.CostEstimate(
        flops=2 * B * (S * H + H * A_pad),
        transcendentals=0,
        bytes_accessed=(B * S * 4                      # x read (f32)
                        + B * A_pad * 2                # out write (bf16)
                        + S * H * 2 + H * A_pad * 2    # weights (bf16)
                        + (H + A_pad) * 4),            # biases (f32)
    )

    out = pl.pallas_call(
        _actor_kernel,
        out_shape=jax.ShapeDtypeStruct((B, A_pad), _OUT_STORE_DTYPE),
        grid_spec=pl.GridSpec(
            grid=grid,
            in_specs=[
                pl.BlockSpec((tb, S), lambda i: (i, 0)),       # x tile (pipelined)
                pl.BlockSpec((S, H), lambda i: (0, 0)),        # W1 (VMEM-resident)
                pl.BlockSpec((1, H), lambda i: (0, 0)),        # b1 (VMEM-resident)
                pl.BlockSpec((H, A_pad), lambda i: (0, 0)),    # W2 (VMEM-resident)
                pl.BlockSpec((1, A_pad), lambda i: (0, 0)),    # b2 (VMEM-resident)
            ],
            out_specs=pl.BlockSpec((tb, A_pad), lambda i: (i, 0)),
        ),
        compiler_params=pltpu.CompilerParams(
            dimension_semantics=("parallel",),      # megacore sharding on v7x
            vmem_limit_bytes=32 * 1024 * 1024,      # ~11 MiB used at tb=4096
        ),
        cost_estimate=cost,
    )(state, w1_c, b1_2d, w2_c, b2_2d)

    # Drop the lane padding and restore the module's f32 output contract.
    return out[:, :A].astype(jnp.float32)


def reference_forward(state, w1, b1, w2, b2, matmul_dtype=jnp.float32):
    h = jnp.dot(state.astype(matmul_dtype), w1.astype(matmul_dtype),
                preferred_element_type=jnp.float32) + b1
    h = jnp.maximum(h, 0.0)
    o = jnp.dot(h.astype(matmul_dtype), w2.astype(matmul_dtype),
                preferred_element_type=jnp.float32) + b2
    return jnp.maximum(o, 0.0)


if __name__ == "__main__":
    # Small shapes consistent with the module: state_dim=32, action_dim=16.
    batch, state_dim, hidden_dim, action_dim = 8, 32, 256, 16

    key = jax.random.PRNGKey(0)
    k_x, k_w1, k_b1, k_w2, k_b2, k_x2 = jax.random.split(key, 6)

    state = jax.random.normal(k_x, (batch, state_dim), dtype=jnp.float32)

    # Deterministic synthetic params (mirrors the uniform(-0.1, 0.1) init from
    # _init_weights; biases uniform in the same range).
    w1 = jax.random.uniform(k_w1, (state_dim, hidden_dim),
                            minval=-0.1, maxval=0.1, dtype=jnp.float32)
    b1 = jax.random.uniform(k_b1, (hidden_dim,),
                            minval=-0.1, maxval=0.1, dtype=jnp.float32)
    w2 = jax.random.uniform(k_w2, (hidden_dim, action_dim),
                            minval=-0.1, maxval=0.1, dtype=jnp.float32)
    b2 = jax.random.uniform(k_b2, (action_dim,),
                            minval=-0.1, maxval=0.1, dtype=jnp.float32)

    out = dnn_actor_forward(state, w1, b1, w2, b2)
    out = jax.block_until_ready(out)
    assert out.shape == (batch, action_dim)
    assert out.dtype == jnp.float32

    # Check vs a reference using the same bf16-operand / f32-accum math
    # (kernel additionally rounds the stored output to bf16).
    ref_bf16 = reference_forward(state, w1, b1, w2, b2,
                                 matmul_dtype=_MATMUL_DTYPE)
    assert jnp.allclose(out, ref_bf16, atol=3e-2, rtol=3e-2), \
        "mismatch vs bf16-operand reference"

    # Loose sanity check vs the pure-f32 reference.
    ref_f32 = reference_forward(state, w1, b1, w2, b2,
                                matmul_dtype=jnp.float32)
    assert jnp.allclose(out, ref_f32, atol=5e-2, rtol=5e-2), \
        "mismatch vs f32 reference"

    # Ragged batch (not a multiple of the tile / sublane count): exercises the
    # masked tail tile path that replaced the wrapper-side jnp.pad.
    state13 = jax.random.normal(k_x2, (13, state_dim), dtype=jnp.float32)
    out13 = jax.block_until_ready(dnn_actor_forward(state13, w1, b1, w2, b2))
    assert out13.shape == (13, action_dim)
    ref13 = reference_forward(state13, w1, b1, w2, b2,
                              matmul_dtype=_MATMUL_DTYPE)
    assert jnp.allclose(out13, ref13, atol=3e-2, rtol=3e-2), \
        "mismatch on ragged-batch tail"

    print("KERNEL_OK")
</pallas_src>

<mosaic_0001>
module attributes {stable_mosaic.version = 11 : i64} {
  func.func @_actor_kernel(%arg0: i32, %arg1: memref<8x32xf32, #tpu.memory_space<vmem>>, %arg2: memref<32x256xbf16, #tpu.memory_space<vmem>>, %arg3: memref<1x256xf32, #tpu.memory_space<vmem>>, %arg4: memref<256x128xbf16, #tpu.memory_space<vmem>>, %arg5: memref<1x128xf32, #tpu.memory_space<vmem>>, %arg6: memref<8x128xbf16, #tpu.memory_space<vmem>>) attributes {dimension_semantics = [#tpu.dimension_semantics<parallel>], iteration_bounds = array<i64: 1>, scalar_prefetch = 0 : i64, scratch_operands = 0 : i64, tpu.core_type = #tpu.core_type<tc>, window_params = [{transform_indices = @transform_0, window_bounds = array<i64: 8, 32>}, {pipeline_mode = #tpu.pipeline_mode<synchronous>, transform_indices = @transform_1, window_bounds = array<i64: 32, 256>}, {pipeline_mode = #tpu.pipeline_mode<synchronous>, transform_indices = @transform_2, window_bounds = array<i64: 1, 256>}, {pipeline_mode = #tpu.pipeline_mode<synchronous>, transform_indices = @transform_3, window_bounds = array<i64: 256, 128>}, {pipeline_mode = #tpu.pipeline_mode<synchronous>, transform_indices = @transform_4, window_bounds = array<i64: 1, 128>}, {transform_indices = @transform_5, window_bounds = array<i64: 8, 128>}]} {
    %c0 = arith.constant 0 : index
    %c0_0 = arith.constant 0 : index
    %0 = vector.load %arg1[%c0, %c0_0] : memref<8x32xf32, #tpu.memory_space<vmem>>, vector<8x32xf32>
    %1 = arith.truncf %0 : vector<8x32xf32> to vector<8x32xbf16>
    %c0_1 = arith.constant 0 : index
    %c0_2 = arith.constant 0 : index
    %2 = vector.load %arg2[%c0_1, %c0_2] : memref<32x256xbf16, #tpu.memory_space<vmem>>, vector<32x256xbf16>
    %cst = arith.constant dense<0.000000e+00> : vector<8x256xf32>
    %3 = tpu.matmul %1, %2, %cst {dimension_numbers = #tpu.dot_dimension_numbers<[1], [0], [0], [1], [0, 0, 1, 1], [], []>} : vector<8x32xbf16>, vector<32x256xbf16>, vector<8x256xf32> -> vector<8x256xf32>
    %c0_3 = arith.constant 0 : index
    %c0_4 = arith.constant 0 : index
    %4 = vector.load %arg3[%c0_3, %c0_4] : memref<1x256xf32, #tpu.memory_space<vmem>>, vector<1x256xf32>
    %5 = vector.broadcast %4 : vector<1x256xf32> to vector<8x256xf32>
    %6 = arith.addf %3, %5 : vector<8x256xf32>
    %cst_5 = arith.constant 0.000000e+00 : f32
    %7 = vector.broadcast %cst_5 : f32 to vector<8x256xf32>
    %8 = arith.maximumf %6, %7 : vector<8x256xf32>
    %9 = arith.truncf %8 : vector<8x256xf32> to vector<8x256xbf16>
    %c0_6 = arith.constant 0 : index
    %c0_7 = arith.constant 0 : index
    %10 = vector.load %arg4[%c0_6, %c0_7] : memref<256x128xbf16, #tpu.memory_space<vmem>>, vector<256x128xbf16>
    %cst_8 = arith.constant dense<0.000000e+00> : vector<8x128xf32>
    %11 = tpu.matmul %9, %10, %cst_8 {dimension_numbers = #tpu.dot_dimension_numbers<[1], [0], [0], [1], [0, 0, 1, 1], [], []>} : vector<8x256xbf16>, vector<256x128xbf16>, vector<8x128xf32> -> vector<8x128xf32>
    %c0_9 = arith.constant 0 : index
    %c0_10 = arith.constant 0 : index
    %12 = vector.load %arg5[%c0_9, %c0_10] : memref<1x128xf32, #tpu.memory_space<vmem>>, vector<1x128xf32>
    %13 = vector.broadcast %12 : vector<1x128xf32> to vector<8x128xf32>
    %14 = arith.addf %11, %13 : vector<8x128xf32>
    %cst_11 = arith.constant 0.000000e+00 : f32
    %15 = vector.broadcast %cst_11 : f32 to vector<8x128xf32>
    %16 = arith.maximumf %14, %15 : vector<8x128xf32>
    %17 = arith.truncf %16 : vector<8x128xf32> to vector<8x128xbf16>
    %c0_12 = arith.constant 0 : index
    %c0_13 = arith.constant 0 : index
    %18 = vector.load %arg6[%c0_12, %c0_13] : memref<8x128xbf16, #tpu.memory_space<vmem>>, vector<8x128xbf16>
    tpu.vector_store %arg6[%c0_12, %c0_13], %17 {strides = array<i32>} : memref<8x128xbf16, #tpu.memory_space<vmem>>, vector<8x128xbf16>,
    return
  }
  func.func @transform_0(%arg0: i32) -> (i32, i32) {
    %c0_i32 = arith.constant 0 : i32
    %c0_i32_0 = arith.constant 0 : i32
    return %arg0, %c0_i32 : i32, i32
  }
  func.func @transform_1(%arg0: i32) -> (i32, i32) {
    %c0_i32 = arith.constant 0 : i32
    %c0_i32_0 = arith.constant 0 : i32
    %c0_i32_1 = arith.constant 0 : i32
    return %c0_i32, %c0_i32_0 : i32, i32
  }
  func.func @transform_2(%arg0: i32) -> (i32, i32) {
    %c0_i32 = arith.constant 0 : i32
    %c0_i32_0 = arith.constant 0 : i32
    %c0_i32_1 = arith.constant 0 : i32
    return %c0_i32, %c0_i32_0 : i32, i32
  }
  func.func @transform_3(%arg0: i32) -> (i32, i32) {
    %c0_i32 = arith.constant 0 : i32
    %c0_i32_0 = arith.constant 0 : i32
    %c0_i32_1 = arith.constant 0 : i32
    return %c0_i32, %c0_i32_0 : i32, i32
  }
  func.func @transform_4(%arg0: i32) -> (i32, i32) {
    %c0_i32 = arith.constant 0 : i32
    %c0_i32_0 = arith.constant 0 : i32
    %c0_i32_1 = arith.constant 0 : i32
    return %c0_i32, %c0_i32_0 : i32, i32
  }
  func.func @transform_5(%arg0: i32) -> (i32, i32) {
    %c0_i32 = arith.constant 0 : i32
    %c0_i32_0 = arith.constant 0 : i32
    return %arg0, %c0_i32 : i32, i32
  }
}

</mosaic_0001>

<bundles_post_ra>
// kernel: dnn_actor_forward.1
= control target key start
LH: loop header
LB: loop body
LE: loop exit
PB: predicated region body
PF: predicated region fallthrough
CT: control target
= control target key end

     0   :  { %v357_v1 = vmov 0   ;;  %vm59_vm0 = vcmask 261120   ;;  %v29_v23 = vlaneseq  ;;  %s460_s1 = inlined_call_operand.vmem [shape: bf16[32,256], index: 1, kind: input, shape index: {}]   ;;  %s461_s0 = inlined_call_operand.vmem [shape: f32[8,32], index: 0, kind: input, shape index: {}]   ;;  %s462_s3 = inlined_call_operand.vmem [shape: bf16[256,128], index: 3, kind: input, shape index: {}]   ;;  %s463_s2 = inlined_call_operand.vmem [shape: f32[1,256], index: 2, kind: input, shape index: {}]   ;;  %s464_s4 = inlined_call_operand.vmem [shape: f32[1,128], index: 4, kind: input, shape index: {}]   ;;  %s465_s5 = inlined_call_operand.vmem [shape: bf16[8,128], index: 5, kind: output, shape index: {}]  }
   0x1   :  { %v335_v0 = vld [vmem:[%s460_s1 + $0x4] ss:$8 sps:$4 sm:$0xff]   ;;  %95 = vmatprep.mubr.bf16.mxu0 %v357_v1  ;;  %v337_v2 = vld [vmem:[%s460_s1] ss:$8 sps:$4 sm:$0xff]   ;;  %v338_v3 = vld [vmem:[%s460_s1 + $0x14] ss:$8 sps:$4 sm:$0xff]  }
   0x2   :  { %63 = vmatprep.subr.bf16.mxu0 %v335_v0  ;;  %v340_v4 = vld [vmem:[%s460_s1 + $0x10] ss:$8 sps:$4 sm:$0xff]   ;;  %v21_v5 = vld [vmem:[%s461_s0] sm:$0xff]  ;;  %v343_v8 = vld [vmem:[%s462_s3 + $0x48] sm:$0xff]   ;;  %v30_v24 = vshrl.u32 %v29_v23, 7 }
   0x3   :  { %64 = vmatpush1.bf16.msra.mxu0 %v337_v2  ;;  %v341_v6 = vld [vmem:[%s462_s3 + $0x40] sm:$0xff]   ;;  %v22_v9 = vpack.c.bf16 %v21_v5, %v21_v5  ;;  %v344_v10 = vld [vmem:[%s462_s3 + $0x8] sm:$0xff]   ;;  %v345_v11 = vld [vmem:[%s462_s3 + $0x50] sm:$0xff]  }
   0x4   :  { %65 = vmatprep.subr.bf16.mxu0 %v338_v3  ;;  %v342_v7 = vld [vmem:[%s462_s3] sm:$0xff]   ;;  %312 = vmatprep.subr.bf16.mxu1 %v341_v6  ;;  %v346_v12 = vld [vmem:[%s462_s3 + $0x10] sm:$0xff]   ;;  %v347_v13 = vld [vmem:[%s462_s3 + $0x58] sm:$0xff]   ;;  %v31_v25 = vsub.s32 0, %v30_v24  ;;  %v35_v27 = vsub.s32 1, %v30_v24 }
   0x5   :  { %313 = vmatpush3.bf16.msra.mxu1 %v342_v7  ;;  %v348_v14 = vld [vmem:[%s462_s3 + $0x18] sm:$0xff]   ;;  %v349_v15 = vld [vmem:[%s462_s3 + $0x60] sm:$0xff]   ;;  %v351_v17 = vld [vmem:[%s462_s3 + $0x68] sm:$0xff]  }
   0x6   :  { %314 = vmatprep.subr.bf16.mxu1 %v343_v8  ;;  %v350_v16 = vld [vmem:[%s462_s3 + $0x20] sm:$0xff]   ;;  %v352_v18 = vld [vmem:[%s462_s3 + $0x28] sm:$0xff]   ;;  %v353_v19 = vld [vmem:[%s462_s3 + $0x70] sm:$0xff]  }
   0x7   :  { %66 = vmatpush1.bf16.msra.mxu0 %v340_v4  ;;  %v354_v20 = vld [vmem:[%s462_s3 + $0x30] sm:$0xff]   ;;  %v355_v21 = vld [vmem:[%s462_s3 + $0x78] sm:$0xff]   ;;  %v27_v26 = vld [vmem:[%s463_s2] sm:$0x3] }
   0x8   :  { %v356_v22 = vld [vmem:[%s462_s3 + $0x38] sm:$0xff]   ;;  %v32_v28 = vrot.slane %v27_v26, %v31_v25  ;;  %v36_v29 = vrot.slane %v27_v26, %v35_v27  ;;  %v295_v41 = vld [vmem:[%s464_s4] ss:$0 sm:$0xff] }
   0x9   :  { %315 = vmatpush3.bf16.msra.mxu1 %v344_v10 }
   0xa   :  { %294 = vmatmul.mubr.msk.bf16.vlgmr.msra.gmra.mrb[0].mxu0 %vm59_vm0, %v22_v9  ;;  %316 = vmatprep.subr.bf16.mxu1 %v345_v11 }
   0xd   :  { %317 = vmatpush3.bf16.msra.mxu1 %v346_v12 }
   0xe   :  { %318 = vmatprep.subr.bf16.mxu1 %v347_v13 }
  0x11   :  { %319 = vmatpush3.bf16.msra.mxu1 %v348_v14 }
  0x12   :  { %320 = vmatprep.subr.bf16.mxu1 %v349_v15 }
  0x15   :  { %321 = vmatpush3.bf16.msra.mxu1 %v350_v16 }
  0x16   :  { %322 = vmatprep.subr.bf16.mxu1 %v351_v17 }
  0x19   :  { %323 = vmatpush3.bf16.msra.mxu1 %v352_v18 }
  0x1a   :  { %324 = vmatprep.subr.bf16.mxu1 %v353_v19 }
  0x1d   :  { %325 = vmatpush3.bf16.msra.mxu1 %v354_v20 }
  0x1e   :  { %326 = vmatprep.subr.bf16.mxu1 %v355_v21 }
  0x21   :  { %327 = vmatpush3.bf16.msra.mxu1 %v356_v22 }
  0xdd   :  { %v97_v30 = vpop.f32.mrb[0].mxu0 }
  0xde   :  { %v98_v31 = vadd.f32 %v97_v30, %v32_v28  ;;  %v99_v32 = vpop.f32.mrb[1].mxu0 }
  0xdf   :  { %v100_v33 = vadd.f32 %v99_v32, %v36_v29  ;;  %v101_v34 = vpop.f32.mrb[2].mxu0 }
  0xe0   :  { %v104_v35 = vmax.f32 %v98_v31, 0.0  ;;  %v102_v36 = vpop.f32.mrb[3].mxu0 }
  0xe1   :  { %v105_v37 = vmax.f32 %v100_v33, 0.0 }
  0xe2   :  { %v106_v39 = vpack.c.bf16 %v104_v35, %v104_v35 }
  0xe3   :  { %v107_v38 = vpack.c.bf16 %v105_v37, %v105_v37 }
  0xe5   :  { %275 = vmatprep.mubr.bf16.mxu1 %v107_v38 }
  0xe6   :  { %276 = vmatmul.mubr.bf16.vlgmr.msra.gmra.mrb[0].mxu1 %v106_v39 }
 0x1b9   :  { %v328_v40 = vpop.f32.mrb[0].mxu1 }
 0x1ba   :  { %v329_v42 = vpop.f32.mrb[1].mxu1 }
 0x1bb   :  { %v330_v43 = vadd.f32 %v329_v42, %v328_v40  ;;  %v331_v44 = vpop.f32.mrb[2].mxu1 }
 0x1bc   :  { %v332_v45 = vpop.f32.mrb[3].mxu1 }
 0x1bd   :  { %v278_v46 = vadd.f32 %v330_v43, %v295_v41 }
 0x1bf   :  { %v283_v47 = vmax.f32 %v278_v46, 0.0 }
 0x1c1   :  { %v284_v48 = vpack.c.bf16 %v283_v47, %v283_v47 }
 0x1c3   :  { %285 = vst [vmem:[%s465_s5] sm:$0xf] %v284_v48 }

</bundles_post_ra>
